<compile_context>
chip_gen: v7x
topology: tpu7x:2x2x1
jax: 0.10.0
libtpu: 0.0.40
codegen_flags: <defaults>
</compile_context>

<pallas_src>
import jax
import jax.numpy as jnp
from jax.experimental import pallas as pl
from jax.experimental.pallas import tpu as pltpu


def _round_up(x, m):
    return ((x + m - 1) // m) * m


def _vmem_limit_bytes():
    """Generation-aware VMEM limit (~3/4 of physical, clamped to a safe range)."""
    try:
        cap = int(pltpu.get_tpu_info().vmem_capacity_bytes)
    except Exception:
        cap = 64 * 1024 * 1024  # conservative (v7x-sized) fallback
    return max(32 * 1024 * 1024, min(cap * 3 // 4, 100 * 1024 * 1024))


def _pick_tm(tm_req, n_pad, d_pad, itemsize, vmem_limit):
    """Largest query-row tile that divides n_pad and fits the VMEM budget."""
    tm_req = max(8, _round_up(int(tm_req), 8))
    budget = int(vmem_limit * 0.8)
    for cand in (256, 128, 64, 32, 16, 8):
        if cand > tm_req or n_pad % cand != 0:
            continue
        est = (2 * n_pad * d_pad * itemsize      # raw key landing buffer + key cache
               + 2 * cand * d_pad * itemsize     # double-buffered query tile
               + 6 * cand * n_pad * 4            # f32 working slabs (sim/exp/mask/...)
               + 8 * n_pad * 4)                  # labels / misc
        if est <= budget:
            return cand
    return 8


def make_infonce_kernel(B, TM, N_pad, temperature, matmul_dtype):
    inv_temp = 1.0 / float(temperature)
    NEG_LOG_EPS = 23.025850929940457  # -log(1e-10)

    def kernel(labq_ref, labk_ref, emb_q_ref, emb_k_hbm, out_ref,
               kT_scr, raw_scr, dma_sem):
        half = pl.program_id(0)   # 0 -> hyper rows, 1 -> light rows
        tile = pl.program_id(1)   # query-row tile index

        # ---- Build the normalized, transposed key cache once per half. ----
        # Grid axis 1 is "arbitrary" (sequential), so tile == 0 runs first and
        # the scratch persists across the remaining query tiles of this half.
        @pl.when(tile == 0)
        def _():
            cp = pltpu.make_async_copy(emb_k_hbm.at[half], raw_scr, dma_sem)
            cp.start()
            cp.wait()
            k = raw_scr[...].astype(jnp.float32)                      # (N_pad, D_pad)
            # F.normalize(x, dim=1) == x * rsqrt(max(sum(x^2), eps^2)), eps=1e-12.
            inv_nk = jax.lax.rsqrt(
                jnp.maximum(jnp.sum(k * k, axis=1, keepdims=True), 1e-24))
            # Store transposed so the per-step matmul is a plain (TM,D)@(D,N).
            kT_scr[...] = jnp.transpose(k * inv_nk).astype(matmul_dtype)

        # ---- Per-tile query path. ----
        q = emb_q_ref[0].astype(jnp.float32)                          # (TM, D_pad)
        inv_nq = jax.lax.rsqrt(
            jnp.maximum(jnp.sum(q * q, axis=1, keepdims=True), 1e-24))
        # Fold 1/temperature into the existing per-row normalization multiply.
        q = (q * (inv_nq * inv_temp)).astype(matmul_dtype)

        # Similarity slab (TM, N_pad): bf16 MXU operands, f32 accumulation.
        sim = jax.lax.dot_general(
            q, kT_scr[...], (((1,), (0,)), ((), ())),
            preferred_element_type=jnp.float32)

        # Label-equality mask (boolean ops, single where on the exp):
        #   * padded key columns (col >= B) never feed the exp-sum,
        #   * the diagonal is removed only for the hyper half (rows < B).
        eq = labq_ref[...] == labk_ref[...]                           # (TM, N_pad)
        row = jax.lax.broadcasted_iota(jnp.int32, (TM, N_pad), 0) + tile * TM
        col = jax.lax.broadcasted_iota(jnp.int32, (TM, N_pad), 1)
        diag_kill = jnp.logical_and(row == col, half == 0)
        mask = jnp.logical_and(jnp.logical_and(eq, col < B),
                               jnp.logical_not(diag_kill))

        # Reference keeps the row max over ALL columns (masked ones included).
        # Padded key columns have sim == 0 <= the real diagonal (~1/temperature),
        # so they never change the max for real rows.
        logits = sim - jnp.max(sim, axis=1, keepdims=True)
        e = jnp.where(mask, jnp.exp(logits), 0.0)
        denom = jnp.sum(e, axis=1, keepdims=True) + 1e-10             # (TM, 1)

        # -log(e/denom + 1e-10) split algebraically:
        #   mask==1 (valid col): log(denom_row) - logit
        #   mask==0 (valid col): -log(1e-10) == NEG_LOG_EPS
        maskf = mask.astype(jnp.float32)
        m = jnp.sum(maskf, axis=1, keepdims=True)                     # (TM, 1)
        s_logits = jnp.sum(jnp.where(mask, logits, 0.0), axis=1, keepdims=True)
        per_row = m * jnp.log(denom) - s_logits + (B - m) * NEG_LOG_EPS

        # Only real query rows (row < B) count toward the mean.
        row_ok = (jax.lax.broadcasted_iota(jnp.int32, (TM, 1), 0) + tile * TM) < B
        total = jnp.sum(jnp.where(row_ok, per_row, 0.0))

        # Lane-dense (8, 128) partial-sum block: scalar in [0, 0], zeros elsewhere.
        r8 = jax.lax.broadcasted_iota(jnp.int32, (8, 128), 0)
        c8 = jax.lax.broadcasted_iota(jnp.int32, (8, 128), 1)
        out_ref[...] = jnp.where(jnp.logical_and(r8 == 0, c8 == 0),
                                 total, 0.0).reshape(1, 1, 8, 128)

    return kernel


def infonce_loss(hyper_embeddings, light_embeddings, labels, temperature=0.1,
                 tm=256, matmul_dtype=jnp.bfloat16):
    """InfoNCELoss.forward as a Pallas TPU kernel.

    tm:           requested query-row tile size (auto-clamped by VMEM budget).
    matmul_dtype: MXU operand / embedding transfer dtype (bf16 default; pass
                  jnp.float32 for bit-closer parity with the f32 reference).
    """
    B, D = hyper_embeddings.shape

    D_pad = _round_up(D, 128)     # lane-dense feature dim (zero pad is inert)
    N_pad = _round_up(B, 128)     # lane-dense key/column count, independent of TM

    vmem_limit = _vmem_limit_bytes()
    itemsize = jnp.dtype(matmul_dtype).itemsize
    TM = _pick_tm(tm, N_pad, D_pad, itemsize, vmem_limit)
    num_tiles = pl.cdiv(B, TM)

    def pad_emb(x):
        x = jnp.pad(x.astype(jnp.float32), ((0, N_pad - B), (0, D_pad - D)))
        return x.astype(matmul_dtype)   # bf16 transfer: half the DMA bytes / VMEM

    emb = jnp.stack([pad_emb(hyper_embeddings),
                     pad_emb(light_embeddings)])                 # (2, N_pad, D_pad)

    lab = jnp.pad(labels.astype(jnp.int32), (0, N_pad - B), constant_values=-1)
    lab_col = lab.reshape(N_pad, 1)
    lab_row = lab.reshape(1, N_pad)

    kernel = make_infonce_kernel(B, TM, N_pad, temperature, matmul_dtype)

    partials = pl.pallas_call(
        kernel,
        out_shape=jax.ShapeDtypeStruct((2, num_tiles, 8, 128), jnp.float32),
        grid_spec=pltpu.PrefetchScalarGridSpec(
            num_scalar_prefetch=0,
            grid=(2, num_tiles),
            in_specs=[
                pl.BlockSpec((TM, 1), lambda h, i: (i, 0)),          # query-row labels
                pl.BlockSpec((1, N_pad), lambda h, i: (0, 0)),       # key-column labels
                pl.BlockSpec((1, TM, D_pad), lambda h, i: (h, i, 0)),  # query rows
                pl.BlockSpec(memory_space=pl.ANY),                   # keys: raw HBM, manual DMA
            ],
            out_specs=pl.BlockSpec((1, 1, 8, 128), lambda h, i: (h, i, 0, 0)),
            scratch_shapes=[
                pltpu.VMEM((D_pad, N_pad), matmul_dtype),   # cached normalized keys^T
                pltpu.VMEM((N_pad, D_pad), matmul_dtype),   # raw key DMA landing buffer
                pltpu.SemaphoreType.DMA,
            ]),
        compiler_params=pltpu.CompilerParams(
            dimension_semantics=("parallel", "arbitrary"),
            vmem_limit_bytes=vmem_limit),
    )(lab_col, lab_row, emb, emb)

    return jnp.sum(partials) / jnp.float32(2 * B * B)


def infonce_reference(hyper, light, labels, temperature=0.1):
    """Pure-JAX transcription of the PyTorch module (sanity check)."""
    def norm(x):
        n = jnp.sqrt(jnp.sum(x * x, axis=1, keepdims=True))
        return x / jnp.maximum(n, 1e-12)

    h = norm(hyper.astype(jnp.float32))
    l = norm(light.astype(jnp.float32))
    hs = (h @ h.T) / temperature
    ls = (l @ l.T) / temperature
    combined = jnp.concatenate([hs, ls], axis=0)                       # (2B, B)
    B = labels.shape[0]
    eq = (labels[:, None] == labels[None, :]).astype(jnp.float32)
    mask = jnp.concatenate([eq, eq], axis=0)                           # (2B, B)
    mask = mask.at[jnp.arange(B), jnp.arange(B)].set(0.0)              # fill_diagonal_(0)
    logits = combined - jnp.max(combined, axis=1, keepdims=True)
    e = jnp.exp(logits) * mask
    s = jnp.sum(e, axis=1, keepdims=True) + 1e-10
    lp = e / s
    return jnp.mean(-jnp.log(lp + 1e-10))


if __name__ == "__main__":
    key = jax.random.PRNGKey(0)
    k_h, k_l, k_lab = jax.random.split(key, 3)

    B, D = 8, 32   # small batch of embedding vectors
    hyper = jax.random.normal(k_h, (B, D), dtype=jnp.float32)
    light = jax.random.normal(k_l, (B, D), dtype=jnp.float32)
    labels = jax.random.randint(k_lab, (B,), 0, 3, dtype=jnp.int32)

    loss = infonce_loss(hyper, light, labels, temperature=0.1)
    loss = jax.block_until_ready(loss)

    ref = infonce_reference(hyper, light, labels, temperature=0.1)
    assert jnp.isfinite(loss), "loss is not finite"
    assert jnp.allclose(loss, ref, rtol=1e-2, atol=1e-2), (float(loss), float(ref))
    print("KERNEL_OK")
</pallas_src>

<mosaic_0001>
module attributes {stable_mosaic.version = 11 : i64} {
  func.func @kernel(%arg0: i32, %arg1: i32, %arg2: memref<128x1xi32, #tpu.memory_space<vmem>>, %arg3: memref<1x128xi32, #tpu.memory_space<vmem>>, %arg4: memref<1x128x128xbf16, #tpu.memory_space<vmem>>, %arg5: memref<2x128x128xbf16, #tpu.memory_space<any>>, %arg6: memref<1x1x8x128xf32, #tpu.memory_space<vmem>>, %arg7: memref<128x128xbf16, #tpu.memory_space<vmem>>, %arg8: memref<128x128xbf16, #tpu.memory_space<vmem>>, %arg9: memref<!tpu.dma_semaphore, #tpu.memory_space<semaphore_mem>>) attributes {dimension_semantics = [#tpu.dimension_semantics<parallel>, #tpu.dimension_semantics<arbitrary>], iteration_bounds = array<i64: 2, 1>, scalar_prefetch = 0 : i64, scratch_operands = 3 : i64, tpu.core_type = #tpu.core_type<tc>, window_params = [{transform_indices = @transform_0, window_bounds = array<i64: 128, 1>}, {pipeline_mode = #tpu.pipeline_mode<synchronous>, transform_indices = @transform_1, window_bounds = array<i64: 1, 128>}, {transform_indices = @transform_2, window_bounds = array<i64: 1, 128, 128>}, {}, {transform_indices = @transform_4, window_bounds = array<i64: 1, 1, 8, 128>}]} {
    %c0_i32 = arith.constant 0 : i32
    %0 = arith.cmpi eq, %arg1, %c0_i32 : i32
    %1 = arith.extui %0 : i1 to i32
    %c0_i32_0 = arith.constant 0 : i32
    %2 = arith.cmpi ne, %1, %c0_i32_0 : i32
    scf.if %2 {
      %c0_i32_34 = arith.constant 0 : i32
      %c0_i32_35 = arith.constant 0 : i32
      %89 = tpu.memref_slice %arg5[%arg0, %c0_i32_34, %c0_i32_35] : memref<2x128x128xbf16, #tpu.memory_space<any>> -> memref<1x128x128xbf16, #tpu.memory_space<any>>
      %90 = tpu.memref_squeeze %89 : memref<1x128x128xbf16, #tpu.memory_space<any>> -> memref<128x128xbf16, #tpu.memory_space<any>>
      tpu.enqueue_dma source(%90 : memref<128x128xbf16, #tpu.memory_space<any>>) target(%arg8 : memref<128x128xbf16, #tpu.memory_space<vmem>>) target_semaphore(%arg9 : memref<!tpu.dma_semaphore, #tpu.memory_space<semaphore_mem>>)
      %c0_i32_36 = arith.constant 0 : i32
      %c0_i32_37 = arith.constant 0 : i32
      %91 = tpu.memref_slice %arg5[%arg0, %c0_i32_36, %c0_i32_37] : memref<2x128x128xbf16, #tpu.memory_space<any>> -> memref<1x128x128xbf16, #tpu.memory_space<any>>
      %92 = tpu.memref_squeeze %91 : memref<1x128x128xbf16, #tpu.memory_space<any>> -> memref<128x128xbf16, #tpu.memory_space<any>>
      tpu.wait_dma2 semaphore(%arg9 : memref<!tpu.dma_semaphore, #tpu.memory_space<semaphore_mem>>) src(%92 : memref<128x128xbf16, #tpu.memory_space<any>>) dst(%arg8 : memref<128x128xbf16, #tpu.memory_space<vmem>>)
      %c0_38 = arith.constant 0 : index
      %c0_39 = arith.constant 0 : index
      %93 = vector.load %arg8[%c0_38, %c0_39] : memref<128x128xbf16, #tpu.memory_space<vmem>>, vector<128x128xbf16>
      %94 = arith.extf %93 : vector<128x128xbf16> to vector<128x128xf32>
      %95 = arith.mulf %94, %94 : vector<128x128xf32>
      %cst_40 = arith.constant dense<0.000000e+00> : vector<128xf32>
      %96 = vector.multi_reduction <add>, %95, %cst_40 [1] : vector<128x128xf32> to vector<128xf32>
      %97 = vector.shape_cast %96 : vector<128xf32> to vector<128x1xf32>
      %cst_41 = arith.constant 1.000000e-24 : f32
      %98 = vector.broadcast %cst_41 : f32 to vector<128x1xf32>
      %99 = arith.maximumf %97, %98 : vector<128x1xf32>
      %100 = math.rsqrt %99 : vector<128x1xf32>
      %101 = vector.broadcast %100 : vector<128x1xf32> to vector<128x128xf32>
      %102 = arith.mulf %94, %101 : vector<128x128xf32>
      %103 = tpu.transpose %102, [1, 0] : vector<128x128xf32> -> vector<128x128xf32>
      %104 = arith.truncf %103 : vector<128x128xf32> to vector<128x128xbf16>
      %c0_42 = arith.constant 0 : index
      %c0_43 = arith.constant 0 : index
      %105 = vector.load %arg7[%c0_42, %c0_43] : memref<128x128xbf16, #tpu.memory_space<vmem>>, vector<128x128xbf16>
      tpu.vector_store %arg7[%c0_42, %c0_43], %104 {strides = array<i32>} : memref<128x128xbf16, #tpu.memory_space<vmem>>, vector<128x128xbf16>,
    } else {
    }
    %c0 = arith.constant 0 : index
    %c0_1 = arith.constant 0 : index
    %c0_2 = arith.constant 0 : index
    %3 = vector.load %arg4[%c0, %c0_1, %c0_2] : memref<1x128x128xbf16, #tpu.memory_space<vmem>>, vector<1x128x128xbf16>
    %4 = vector.shape_cast %3 : vector<1x128x128xbf16> to vector<128x128xbf16>
    %5 = arith.extf %4 : vector<128x128xbf16> to vector<128x128xf32>
    %6 = arith.mulf %5, %5 : vector<128x128xf32>
    %cst = arith.constant dense<0.000000e+00> : vector<128xf32>
    %7 = vector.multi_reduction <add>, %6, %cst [1] : vector<128x128xf32> to vector<128xf32>
    %8 = vector.shape_cast %7 : vector<128xf32> to vector<128x1xf32>
    %cst_3 = arith.constant 1.000000e-24 : f32
    %9 = vector.broadcast %cst_3 : f32 to vector<128x1xf32>
    %10 = arith.maximumf %8, %9 : vector<128x1xf32>
    %11 = math.rsqrt %10 : vector<128x1xf32>
    %cst_4 = arith.constant 1.000000e+01 : f32
    %12 = vector.broadcast %cst_4 : f32 to vector<128x1xf32>
    %13 = arith.mulf %11, %12 : vector<128x1xf32>
    %14 = vector.broadcast %13 : vector<128x1xf32> to vector<128x128xf32>
    %15 = arith.mulf %5, %14 : vector<128x128xf32>
    %16 = arith.truncf %15 : vector<128x128xf32> to vector<128x128xbf16>
    %c0_5 = arith.constant 0 : index
    %c0_6 = arith.constant 0 : index
    %17 = vector.load %arg7[%c0_5, %c0_6] : memref<128x128xbf16, #tpu.memory_space<vmem>>, vector<128x128xbf16>
    %cst_7 = arith.constant dense<0.000000e+00> : vector<128x128xf32>
    %18 = tpu.matmul %16, %17, %cst_7 {dimension_numbers = #tpu.dot_dimension_numbers<[1], [0], [0], [1], [0, 0, 1, 1], [], []>} : vector<128x128xbf16>, vector<128x128xbf16>, vector<128x128xf32> -> vector<128x128xf32>
    %c0_8 = arith.constant 0 : index
    %c0_9 = arith.constant 0 : index
    %19 = vector.load %arg2[%c0_8, %c0_9] : memref<128x1xi32, #tpu.memory_space<vmem>>, vector<128x1xi32>
    %c0_10 = arith.constant 0 : index
    %c0_11 = arith.constant 0 : index
    %20 = vector.load %arg3[%c0_10, %c0_11] : memref<1x128xi32, #tpu.memory_space<vmem>>, vector<1x128xi32>
    %21 = vector.broadcast %19 : vector<128x1xi32> to vector<128x128xi32>
    %22 = vector.broadcast %20 : vector<1x128xi32> to vector<128x128xi32>
    %23 = arith.cmpi eq, %21, %22 : vector<128x128xi32>
    %24 = tpu.iota {dimensions = array<i32: 0>} : vector<128x128xi32>
    %c128_i32 = arith.constant 128 : i32
    %25 = arith.muli %arg1, %c128_i32 : i32
    %26 = vector.broadcast %25 : i32 to vector<128x128xi32>
    %27 = arith.addi %24, %26 : vector<128x128xi32>
    %28 = tpu.iota {dimensions = array<i32: 1>} : vector<128x128xi32>
    %29 = arith.cmpi eq, %27, %28 : vector<128x128xi32>
    %c0_i32_12 = arith.constant 0 : i32
    %30 = arith.cmpi eq, %arg0, %c0_i32_12 : i32
    %31 = vector.broadcast %30 : i1 to vector<128x128xi1>
    %32 = arith.andi %29, %31 : vector<128x128xi1>
    %c8_i32 = arith.constant 8 : i32
    %33 = vector.broadcast %c8_i32 : i32 to vector<128x128xi32>
    %34 = arith.cmpi slt, %28, %33 : vector<128x128xi32>
    %35 = arith.andi %23, %34 : vector<128x128xi1>
    %cst_13 = arith.constant dense<true> : vector<128x128xi1>
    %36 = arith.xori %32, %cst_13 : vector<128x128xi1>
    %37 = arith.andi %35, %36 : vector<128x128xi1>
    %cst_14 = arith.constant dense<0xFF800000> : vector<128xf32>
    %38 = vector.multi_reduction <maximumf>, %18, %cst_14 [1] : vector<128x128xf32> to vector<128xf32>
    %39 = vector.shape_cast %38 : vector<128xf32> to vector<128x1xf32>
    %40 = vector.broadcast %39 : vector<128x1xf32> to vector<128x128xf32>
    %41 = arith.subf %18, %40 : vector<128x128xf32>
    %42 = math.exp %41 : vector<128x128xf32>
    %cst_15 = arith.constant 0.000000e+00 : f32
    %43 = vector.broadcast %cst_15 : f32 to vector<128x128xf32>
    %44 = arith.select %37, %42, %43 : vector<128x128xi1>, vector<128x128xf32>
    %cst_16 = arith.constant dense<0.000000e+00> : vector<128xf32>
    %45 = vector.multi_reduction <add>, %44, %cst_16 [1] : vector<128x128xf32> to vector<128xf32>
    %46 = vector.shape_cast %45 : vector<128xf32> to vector<128x1xf32>
    %cst_17 = arith.constant 1.000000e-10 : f32
    %47 = vector.broadcast %cst_17 : f32 to vector<128x1xf32>
    %48 = arith.addf %46, %47 : vector<128x1xf32>
    %49 = arith.extui %37 : vector<128x128xi1> to vector<128x128xi32>
    %50 = arith.sitofp %49 : vector<128x128xi32> to vector<128x128xf32>
    %cst_18 = arith.constant dense<0.000000e+00> : vector<128xf32>
    %51 = vector.multi_reduction <add>, %50, %cst_18 [1] : vector<128x128xf32> to vector<128xf32>
    %52 = vector.shape_cast %51 : vector<128xf32> to vector<128x1xf32>
    %cst_19 = arith.constant 0.000000e+00 : f32
    %53 = vector.broadcast %cst_19 : f32 to vector<128x128xf32>
    %54 = arith.select %37, %41, %53 : vector<128x128xi1>, vector<128x128xf32>
    %cst_20 = arith.constant dense<0.000000e+00> : vector<128xf32>
    %55 = vector.multi_reduction <add>, %54, %cst_20 [1] : vector<128x128xf32> to vector<128xf32>
    %56 = vector.shape_cast %55 : vector<128xf32> to vector<128x1xf32>
    %57 = math.log %48 : vector<128x1xf32>
    %58 = arith.mulf %52, %57 : vector<128x1xf32>
    %59 = arith.subf %58, %56 : vector<128x1xf32>
    %cst_21 = arith.constant 8.000000e+00 : f32
    %60 = vector.broadcast %cst_21 : f32 to vector<128x1xf32>
    %61 = arith.subf %60, %52 : vector<128x1xf32>
    %cst_22 = arith.constant 23.0258503 : f32
    %62 = vector.broadcast %cst_22 : f32 to vector<128x1xf32>
    %63 = arith.mulf %61, %62 : vector<128x1xf32>
    %64 = arith.addf %59, %63 : vector<128x1xf32>
    %65 = tpu.iota {dimensions = array<i32: 0>} : vector<128x1xi32>
    %c128_i32_23 = arith.constant 128 : i32
    %66 = arith.muli %arg1, %c128_i32_23 : i32
    %67 = vector.broadcast %66 : i32 to vector<128x1xi32>
    %68 = arith.addi %65, %67 : vector<128x1xi32>
    %c8_i32_24 = arith.constant 8 : i32
    %69 = vector.broadcast %c8_i32_24 : i32 to vector<128x1xi32>
    %70 = arith.cmpi slt, %68, %69 : vector<128x1xi32>
    %cst_25 = arith.constant 0.000000e+00 : f32
    %71 = vector.broadcast %cst_25 : f32 to vector<128x1xf32>
    %72 = arith.select %70, %64, %71 : vector<128x1xi1>, vector<128x1xf32>
    %73 = vector.shape_cast %72 : vector<128x1xf32> to vector<1x128x1xf32>
    %cst_26 = arith.constant dense<0.000000e+00> : vector<1xf32>
    %74 = vector.multi_reduction <add>, %73, %cst_26 [1, 2] : vector<1x128x1xf32> to vector<1xf32>
    %75 = vector.shape_cast %74 : vector<1xf32> to vector<1x1x1xf32>
    %76 = vector.extract %75[0, 0, 0] : f32 from vector<1x1x1xf32>
    %77 = tpu.iota {dimensions = array<i32: 0>} : vector<8x128xi32>
    %78 = tpu.iota {dimensions = array<i32: 1>} : vector<8x128xi32>
    %c0_i32_27 = arith.constant 0 : i32
    %79 = vector.broadcast %c0_i32_27 : i32 to vector<8x128xi32>
    %80 = arith.cmpi eq, %77, %79 : vector<8x128xi32>
    %c0_i32_28 = arith.constant 0 : i32
    %81 = vector.broadcast %c0_i32_28 : i32 to vector<8x128xi32>
    %82 = arith.cmpi eq, %78, %81 : vector<8x128xi32>
    %83 = arith.andi %80, %82 : vector<8x128xi1>
    %cst_29 = arith.constant 0.000000e+00 : f32
    %84 = vector.broadcast %76 : f32 to vector<8x128xf32>
    %85 = vector.broadcast %cst_29 : f32 to vector<8x128xf32>
    %86 = arith.select %83, %84, %85 : vector<8x128xi1>, vector<8x128xf32>
    %87 = vector.shape_cast %86 : vector<8x128xf32> to vector<1x1x8x128xf32>
    %c0_30 = arith.constant 0 : index
    %c0_31 = arith.constant 0 : index
    %c0_32 = arith.constant 0 : index
    %c0_33 = arith.constant 0 : index
    %88 = vector.load %arg6[%c0_30, %c0_31, %c0_32, %c0_33] : memref<1x1x8x128xf32, #tpu.memory_space<vmem>>, vector<1x1x8x128xf32>
    tpu.vector_store %arg6[%c0_30, %c0_31, %c0_32, %c0_33], %87 {strides = array<i32>} : memref<1x1x8x128xf32, #tpu.memory_space<vmem>>, vector<1x1x8x128xf32>,
    return
  }
  func.func @transform_0(%arg0: i32, %arg1: i32) -> (i32, i32) {
    %c0_i32 = arith.constant 0 : i32
    %c0_i32_0 = arith.constant 0 : i32
    return %arg1, %c0_i32 : i32, i32
  }
  func.func @transform_1(%arg0: i32, %arg1: i32) -> (i32, i32) {
    %c0_i32 = arith.constant 0 : i32
    %c0_i32_0 = arith.constant 0 : i32
    %c0_i32_1 = arith.constant 0 : i32
    return %c0_i32, %c0_i32_0 : i32, i32
  }
  func.func @transform_2(%arg0: i32, %arg1: i32) -> (i32, i32, i32) {
    %c0_i32 = arith.constant 0 : i32
    %c0_i32_0 = arith.constant 0 : i32
    return %arg0, %arg1, %c0_i32 : i32, i32, i32
  }
  func.func @transform_4(%arg0: i32, %arg1: i32) -> (i32, i32, i32, i32) {
    %c0_i32 = arith.constant 0 : i32
    %c0_i32_0 = arith.constant 0 : i32
    %c0_i32_1 = arith.constant 0 : i32
    return %arg0, %arg1, %c0_i32, %c0_i32_0 : i32, i32, i32, i32
  }
}

</mosaic_0001>

<bundles_post_ra>
// kernel: tpu_custom_call.1
= control target key start
LH: loop header
LB: loop body
LE: loop exit
PB: predicated region body
PF: predicated region fallthrough
CT: control target
= control target key end

     0   :  { %9 = vsyncpa [#allocation6], 0  ;;  %s2151_s0 = inlined_call_operand.vmem [shape: s32[128,1], index: 0, kind: input, shape index: {}]   ;;  %s2152_s1 = inlined_call_operand.vmem [shape: s32[1,128], index: 1, kind: input, shape index: {}]   ;;  %s2153_s2 = inlined_call_operand.vmem [shape: bf16[2,128,128], index: 2, kind: input, shape index: {}]   ;;  %s2154_s3 = inlined_call_operand.hbm [shape: bf16[2,128,128], index: 3, kind: input, shape index: {}]   ;;  %s2155_s4 = inlined_call_operand.hbm [shape: f32[2,1,8,128], index: 4, kind: output, shape index: {}]  }
   0x1   :  { %11 = vsyncpa [#allocation6 + $0x1], 0  ;;  %s1841_s15 = smov 0   ;;  %s1843_s16 = smov 0  }
   0x2   :  { %s1845_s17 = smov 0   ;;  %s1847_s18 = smov 0  }
   0x3   :  { %s1849_s19 = smov 0   ;;  %s1851_s20 = smov 0  }
   0x4 LB: > { %2159 = sst [smem:[#allocation13_spill]] %s1805_s19  ;;  %s1436_s21 = sadd.s32 4294967295, %s1809_s20   ;;  %s1809_s20 = sphi %s1851_s20, %s17_s20   ;;  %s1805_s19 = sphi %s1849_s19, %s2165_s19   ;;  %s1801_s18 = sphi %s1847_s18, %s2164_s18   ;;  %s1797_s17 = sphi %s1845_s17, %s2168_s17   ;;  %s1793_s16 = sphi %s1843_s16, %s2167_s16   ;;  %s1789_s15 = sphi %s1841_s15, %s2166_s15  }
   0x5   : > { %s1437_s22 = sadd.s32 4294967294, %s1809_s20   ;;  %s29_s23 = sadd.s32 1, %s1805_s19 }
   0x6   : > { %s113_s24 = sadd.s32 1, %s1797_s17  ;;  %p31_p0 = scmp.ge.s32.totalorder %s29_s23, 2 }
   0x7   : > { %p123_p1 = scmp.ne.s32.totalorder %s1797_s17, %s1793_s16  ;;  %p124_p2 = scmp.eq.s32.totalorder %s1436_s21, 1 }
   0x8   : > { %p129_p3 = scmp.ne.s32.totalorder %s1793_s16, %s1789_s15  ;;  %s2170_s23 = smov (%p31_p0, %s29_s23), 0 }
   0x9   : > { %2160 = sst [smem:[#allocation14_spill]] %s2170_s23  ;;  %p1881_p4 = por %p124_p2, %p123_p1 }
   0xa   : > { %p130_p5 = scmp.eq.s32.totalorder %s1437_s22, 1  ;;  %s108_s26 = ssub.s32 %s1805_s19, %s2170_s23 }
   0xb   : > { %p1441_p6 = scmp.ge.s32.totalorder %s1809_s20, 1  ;;  %p111_p7 = scmp.eq.s32.totalorder %s108_s26, 0 }
   0xc   : > { %p1888_p8 = por %p130_p5, %p129_p3  ;;  %p173_p9 = scmp.lt.s32.totalorder %s1809_s20, 3 }
   0xd   : > { %s1894_s28 = scalar_select %p111_p7, %s1797_s17, %s113_s24  }
   0xe   : > { %p174_p10 = pnand %p1441_p6, %p173_p9 }
   0xf   : > { %s2156_s29 = sand.u32 (!%p174_p10), 1, %s1793_s16   ;;  %p213_p11 = scmp.lt.s32.totalorder (!%p174_p10), %s1801_s18, 1 }
  0x10   : > { %177 = sbr.rel (%p174_p10) target bundleno = 1154 (0x482), region = 32  ;;  %s1900_s30 = sshll.u32 (!%p174_p10), %s2156_s29, 3 }
  0x11   : > { %s1470_s5 = sshll.u32 (!%p174_p10), %s1801_s18, 10  ;;  %s1811_s11 = smov (!%p174_p10), [#allocation3]  }
  0x12   : > { %s229_s9 = scalar_lea.hbm (!%p174_p10), %s2154_s3, %s1470_s5  ;;  %s237_s12 = sshll.u32 (!%p174_p10), %s1811_s11, 4  ;;  %s238_s12 = int_to_ptr.vmem [resolvable:$true] %s237_s12 }
  0x13   : > { %s1705_s22 = scalar_lea.hbm (!%p174_p10), %s229_s9, 1024  ;;  %s1707_s29 = scalar_lea.hbm (!%p174_p10), %s2154_s3, 2048 }
  0x14   : > { %p1706_p12 = scmp.ne.s32.totalorder (!%p174_p10), %s229_s9, %s1705_s22  ;;  %p1708_p13 = scmp.lt.u32.totalorder (!%p174_p10), %s229_s9, %s2154_s3 }
  0x15   : > { %p1709_p0 = scmp.lt.u32.totalorder (!%p174_p10), %s1707_s29, %s1705_s22  ;;  %p1711_p2 = scmp.lt.u32.totalorder (!%p174_p10), %s1705_s22, %s229_s9 }
  0x17   : > { %s214_s6 = scalar_select %p213_p11, %s1801_s18, 1 }
  0x18   : > { %p1710_p1 = por %p1709_p0, %p1708_p13 }
  0x19   : > { %s1469_s10 = sshll.u32 %s214_s6, 6 }
  0x1a   : > { %s1910_s21 = scalar_lea.vmem %s2153_s2, %s1469_s10  ;;  %p1712_p3 = por %p1711_p2, %p1710_p1 }
  0x1c   : > { %p1713_p5 = pnand %p1712_p3, %p1706_p12 }
  0x1e   : > { %1716 = shalt.err (!%p1713_p5)  }
  0x1f   : > { %s1717_s5 = scalar_lea.vmem %s238_s12, 1024  ;;  %p1722_p7 = scmp.lt.s32.totalorder %s238_s12, %s238_s12 }
  0x20   : > { %p1718_p6 = scmp.ne.s32.totalorder %s238_s12, %s1717_s5  ;;  %p1723_p9 = scmp.lt.s32.totalorder %s1717_s5, %s1717_s5 }
  0x22   : > { %p1724_p10 = por %p1723_p9, %p1722_p7 }
  0x24   : > { %p1725_p11 = pnand %p1724_p10, %p1718_p6 }
  0x26   : > { %1728 = shalt.err (!%p1725_p11)  }
  0x27   : > { %240 = dma.hbm_to_vmem [thread:$0]  %s229_s9, 1024, %s238_s12, [#allocation4] }
  0x28   : > { %s205_s6 = scalar_lea.vmem [#allocation5], %s1900_s30 }
  0x29   : > { %1781 = dma.done.wait [#allocation4], 1024 }
  0x2a   : > { %1782 = vsyncadd [#allocation4], 4294966272  ;;  %v245_v0 = vld [vmem:[#allocation3] sm:$0xff]  ;;  %v246_v1 = vld [vmem:[#allocation3 + $0x8] sm:$0xff]  ;;  %p808_p12 = scmp.eq.s32.totalorder %s1801_s18, 0  ;;  %vm1813_vm4 = vmmov 1  }
  0x2b   : > { %v1919_v2 = vunpack.c.l.bf16 %v245_v0  ;;  %v1921_v3 = vunpack.c.h.bf16 %v245_v0  ;;  %v1923_v4 = vunpack.c.l.bf16 %v246_v1  ;;  %v1925_v5 = vunpack.c.h.bf16 %v246_v1  ;;  %v247_v6 = vld [vmem:[#allocation3 + $0x10] sm:$0xff]  ;;  %v248_v13 = vld [vmem:[#allocation3 + $0x18] sm:$0xff]  ;;  %v249_v18 = vld [vmem:[#allocation3 + $0x20] sm:$0xff]  ;;  %s1465_s9 = sshll.u32 %s1801_s18, 7  ;;  %s1339_s10 = sshll.u32 %s205_s6, 4  ;;  %s2102_s10 = int_to_ptr.vmem [resolvable:$true] %s1339_s10 }
  0x2c   : > { %v1935_v11 = vunpack.c.l.bf16 %v247_v6  ;;  %v1937_v12 = vunpack.c.h.bf16 %v247_v6  ;;  %v1943_v16 = vunpack.c.l.bf16 %v248_v13  ;;  %v1945_v17 = vunpack.c.h.bf16 %v248_v13  ;;  %v250_v23 = vld [vmem:[#allocation3 + $0x28] sm:$0xff]  ;;  %v251_v28 = vld [vmem:[#allocation3 + $0x30] sm:$0xff]  ;;  %v252_v33 = vld [vmem:[#allocation3 + $0x38] sm:$0xff]  ;;  %s809_s29 = scalar_select %p808_p12, 1, 0 }
  0x2d   : > { %v269_v7 = vmul.f32 %v1919_v2, %v1919_v2  ;;  %v271_v8 = vmul.f32 %v1923_v4, %v1923_v4  ;;  %v270_v9 = vmul.f32 %v1921_v3, %v1921_v3  ;;  %v272_v10 = vmul.f32 %v1925_v5, %v1925_v5  ;;  %v1472_v38 = vld [vmem:[%s1910_s21] sm:$0xff]   ;;  %v1503_v43 = vld [vmem:[%s1910_s21 + $0x8] sm:$0xff]   ;;  %s2100_s14 = scalar_lea.hbm %s2155_s4, %s1465_s9  ;;  %s1729_s22 = scalar_lea.vmem %s2102_s10, 128 }
  0x2e   : > { %v273_v14 = vmul.f32 %v1935_v11, %v1935_v11  ;;  %v274_v15 = vmul.f32 %v1937_v12, %v1937_v12  ;;  %v275_v19 = vmul.f32 %v1943_v16, %v1943_v16  ;;  %v276_v20 = vmul.f32 %v1945_v17, %v1945_v17  ;;  %p1730_p13 = scmp.ne.s32.totalorder %s2102_s10, %s1729_s22  ;;  %s1815_s24 = smov [#allocation5]  }
  0x2f   : > { %285 = vadd.xlane.f32.xlu0 %v269_v7  ;;  %289 = vadd.xlane.f32.xlu1 %v271_v8  ;;  %v1951_v21 = vunpack.c.l.bf16 %v249_v18  ;;  %v1953_v22 = vunpack.c.h.bf16 %v249_v18  ;;  %v1959_v26 = vunpack.c.l.bf16 %v250_v23  ;;  %v1961_v27 = vunpack.c.h.bf16 %v250_v23  ;;  %s1733_s26 = sshll.u32 %s1815_s24, 4  ;;  %s1734_s26 = int_to_ptr.vmem [resolvable:$false] %s1733_s26 }
  0x30   : > { %v1967_v31 = vunpack.c.l.bf16 %v251_v28  ;;  %v1969_v32 = vunpack.c.h.bf16 %v251_v28  ;;  %v1975_v36 = vunpack.c.l.bf16 %v252_v33  ;;  %v1977_v37 = vunpack.c.h.bf16 %v252_v33  ;;  %p1731_p0 = pnand %p1730_p13, %p1881_p4  ;;  %s1735_s5 = scalar_lea.vmem %s1734_s26, 256 }
  0x31   : > { %v277_v24 = vmul.f32 %v1951_v21, %v1951_v21  ;;  %v278_v25 = vmul.f32 %v1953_v22, %v1953_v22  ;;  %v279_v29 = vmul.f32 %v1959_v26, %v1959_v26  ;;  %v280_v30 = vmul.f32 %v1961_v27, %v1961_v27  ;;  %p1736_p2 = scmp.lt.s32.totalorder %s2102_s10, %s1734_s26  ;;  %p1737_p3 = scmp.lt.s32.totalorder %s1735_s5, %s1729_s22 }
  0x32   : > { %v281_v34 = vmul.f32 %v1967_v31, %v1967_v31  ;;  %v282_v35 = vmul.f32 %v1969_v32, %v1969_v32  ;;  %v283_v39 = vmul.f32 %v1975_v36, %v1975_v36  ;;  %v284_v40 = vmul.f32 %v1977_v37, %v1977_v37  ;;  %p1732_p1 = pneg %p1731_p0 }
  0x33   : > { %287 = vadd.xlane.f32.xlu0 %v270_v9  ;;  %291 = vadd.xlane.f32.xlu1 %v272_v10  ;;  %v1984_v41 = vunpack.c.h.bf16 %v1472_v38  ;;  %v1986_v42 = vunpack.c.l.bf16 %v1472_v38  ;;  %v1993_v46 = vunpack.c.h.bf16 %v1503_v43  ;;  %v1995_v47 = vunpack.c.l.bf16 %v1503_v43  ;;  %p1738_p5 = por %p1737_p3, %p1736_p2 }
  0x34   : > { %vm1277_vm9 = vcmask 7168  }
  0x35   : > { %v446_v44 = vmul.f32 %v1984_v41, %v1984_v41  ;;  %v445_v45 = vmul.f32 %v1986_v42, %v1986_v42  ;;  %v448_v48 = vmul.f32 %v1993_v46, %v1993_v46  ;;  %v447_v49 = vmul.f32 %v1995_v47, %v1995_v47  ;;  %p1739_p6 = pnand %p1738_p5, %p1732_p1 }
  0x37   : > { %293 = vadd.xlane.f32.xlu0 %v273_v14  ;;  %295 = vadd.xlane.f32.xlu1 %v274_v15 }
  0x3b   : > { %297 = vadd.xlane.f32.xlu0 %v275_v19  ;;  %299 = vadd.xlane.f32.xlu1 %v276_v20 }
  0x3f   : > { %301 = vadd.xlane.f32.xlu0 %v277_v24  ;;  %303 = vadd.xlane.f32.xlu1 %v278_v25 }
  0x43   : > { %305 = vadd.xlane.f32.xlu0 %v279_v29  ;;  %307 = vadd.xlane.f32.xlu1 %v280_v30 }
  0x47   : > { %309 = vadd.xlane.f32.xlu0 %v281_v34  ;;  %311 = vadd.xlane.f32.xlu1 %v282_v35 }
  0x4b   : > { %313 = vadd.xlane.f32.xlu0 %v283_v39  ;;  %315 = vadd.xlane.f32.xlu1 %v284_v40 }
  0x4f   : > { %463 = vadd.xlane.f32.xlu1 %v446_v44  ;;  %461 = vadd.xlane.f32.xlu0 %v445_v45 }
  0x53   : > { %467 = vadd.xlane.f32.xlu1 %v448_v48  ;;  %465 = vadd.xlane.f32.xlu0 %v447_v49 }
  0xbc   : > { %v286_v50 = vpop.xlane.xlu0 %285  ;;  %v290_v51 = vpop.xlane.xlu1 %289 }
  0xbd   : > { %v317_v52 = vmax.f32 %v286_v50, 1e-24  ;;  %v319_v53 = vmax.f32 %v290_v51, 1e-24 }
  0xbf   : > { %1637 = vrsqrt.f32 %v317_v52 }
  0xc0   : > { %v288_v54 = vpop.xlane.xlu0 %287  ;;  %v292_v55 = vpop.xlane.xlu1 %291  ;;  %1639 = vrsqrt.f32 %v319_v53 }
  0xc1   : > { %v318_v56 = vmax.f32 %v288_v54, 1e-24  ;;  %v320_v57 = vmax.f32 %v292_v55, 1e-24 }
  0xc3   : > { %1641 = vrsqrt.f32 %v318_v56 }
  0xc4   : > { %v294_v58 = vpop.xlane.xlu0 %293  ;;  %v296_v59 = vpop.xlane.xlu1 %295  ;;  %1643 = vrsqrt.f32 %v320_v57 }
  0xc5   : > { %v321_v60 = vmax.f32 %v294_v58, 1e-24  ;;  %v322_v1 = vmax.f32 %v296_v59, 1e-24 }
  0xc7   : > { %1645 = vrsqrt.f32 %v321_v60 }
  0xc8   : > { %v298_v61 = vpop.xlane.xlu0 %297  ;;  %v300_v62 = vpop.xlane.xlu1 %299  ;;  %1647 = vrsqrt.f32 %v322_v1 }
  0xc9   : > { %v1638_v63 = vpop.eup %1637  ;;  %v323_v13 = vmax.f32 %v298_v61, 1e-24  ;;  %v324_v20 = vmax.f32 %v300_v62, 1e-24 }
  0xca   : > { %v349_v0 = vmul.f32 %v1638_v63, %v1919_v2  ;;  %v1640_v6 = vpop.eup %1639 }
  0xcb   : > { %v351_v14 = vmul.f32 %v1640_v6, %v1923_v4  ;;  %1649 = vrsqrt.f32 %v323_v13 }
  0xcc   : > { %365 = vxpose.xlu0.b32.start [1/16] %v349_v0, 128  ;;  %v302_v7 = vpop.xlane.xlu0 %301  ;;  %v304_v8 = vpop.xlane.xlu1 %303  ;;  %1651 = vrsqrt.f32 %v324_v20 }
  0xcd   : > { %v1642_v9 = vpop.eup %1641  ;;  %v325_v28 = vmax.f32 %v302_v7, 1e-24  ;;  %v326_v4 = vmax.f32 %v304_v8, 1e-24 }
  0xce   : > { %v350_v10 = vmul.f32 %v1642_v9, %v1921_v3  ;;  %v1644_v19 = vpop.eup %1643 }
  0xcf   : > { %v352_v2 = vmul.f32 %v1644_v19, %v1925_v5  ;;  %1653 = vrsqrt.f32 %v325_v28 }
  0xd0   : > { %366 = vxpose.xlu0.b32.cont [2/16] %v350_v10, 128  ;;  %v306_v15 = vpop.xlane.xlu0 %305  ;;  %v308_v18 = vpop.xlane.xlu1 %307  ;;  %1655 = vrsqrt.f32 %v326_v4 }
  0xd1   : > { %v1646_v25 = vpop.eup %1645  ;;  %v327_v43 = vmax.f32 %v306_v15, 1e-24  ;;  %v328_v45 = vmax.f32 %v308_v18, 1e-24 }
  0xd2   : > { %v353_v3 = vmul.f32 %v1646_v25, %v1935_v11  ;;  %v1648_v33 = vpop.eup %1647 }
  0xd3   : > { %v354_v34 = vmul.f32 %v1648_v33, %v1937_v12 }
  0xd4   : > { %367 = vxpose.xlu0.b32.cont [3/16] %v351_v14, 128  ;;  %v310_v23 = vpop.xlane.xlu0 %309  ;;  %v312_v24 = vpop.xlane.xlu1 %311  ;;  %v1504_v14 = vld [vmem:[%s1910_s21 + $0x10] sm:$0xff]  }
  0xd5   : > { %v1650_v39 = vpop.eup %1649  ;;  %v329_v12 = vmax.f32 %v310_v23, 1e-24  ;;  %v330_v55 = vmax.f32 %v312_v24, 1e-24  ;;  %v2038_v18 = vunpack.c.l.bf16 %v1504_v14  ;;  %v2042_v20 = vunpack.c.h.bf16 %v1504_v14 }
  0xd6   : > { %v355_v44 = vmul.f32 %v1650_v39, %v1943_v16  ;;  %v1652_v11 = vpop.eup %1651 }
  0xd7   : > { %v356_v48 = vmul.f32 %v1652_v11, %v1945_v17  ;;  %v449_v19 = vmul.f32 %v2038_v18, %v2038_v18  ;;  %v450_v23 = vmul.f32 %v2042_v20, %v2042_v20 }
  0xd8   : > { %368 = vxpose.xlu0.b32.cont [4/16] %v352_v2, 128  ;;  %v314_v29 = vpop.xlane.xlu0 %313  ;;  %v316_v30 = vpop.xlane.xlu1 %315  ;;  %v1508_v2 = vld [vmem:[%s1910_s21 + $0x30] sm:$0xff]  }
  0xd9   : > { %v1654_v49 = vpop.eup %1653  ;;  %v331_v59 = vmax.f32 %v314_v29, 1e-24  ;;  %v332_v62 = vmax.f32 %v316_v30, 1e-24  ;;  %v2047_v24 = vunpack.c.l.bf16 %v1508_v2  ;;  %v2051_v28 = vunpack.c.h.bf16 %v1508_v2 }
  0xda   : > { %v1656_v50 = vpop.eup %1655  ;;  %v357_v51 = vmul.f32 %v1654_v49, %v1951_v21 }
  0xdb   : > { %v358_v56 = vmul.f32 %v1656_v50, %v1953_v22  ;;  %v457_v25 = vmul.f32 %v2047_v24, %v2047_v24  ;;  %v458_v29 = vmul.f32 %v2051_v28, %v2051_v28 }
  0xdc   : > { %369 = vxpose.xlu0.b32.cont [5/16] %v353_v3, 128  ;;  %v464_v35 = vpop.xlane.xlu1 %463  ;;  %v462_v38 = vpop.xlane.xlu0 %461  ;;  %v1505_v3 = vld [vmem:[%s1910_s21 + $0x18] sm:$0xff]  }
  0xdd   : > { %v494_v5 = vmax.f32 %v464_v35, 1e-24  ;;  %v493_v40 = vmax.f32 %v462_v38, 1e-24  ;;  %v2056_v30 = vunpack.c.l.bf16 %v1505_v3  ;;  %v2060_v4 = vunpack.c.h.bf16 %v1505_v3 }
  0xdf   : > { %1657 = vrsqrt.f32 %v494_v5  ;;  %v451_v33 = vmul.f32 %v2056_v30, %v2056_v30  ;;  %v452_v35 = vmul.f32 %v2060_v4, %v2060_v4 }
  0xe0   : > { %370 = vxpose.xlu0.b32.cont [6/16] %v354_v34, 128  ;;  %1659 = vrsqrt.f32 %v493_v40  ;;  %v1509_v34 = vld [vmem:[%s1910_s21 + $0x38] sm:$0xff]  }
  0xe1   : > { %1661 = vrsqrt.f32 %v327_v43  ;;  %v2065_v38 = vunpack.c.l.bf16 %v1509_v34  ;;  %v2069_v5 = vunpack.c.h.bf16 %v1509_v34  ;;  %v466_v43 = vpop.xlane.xlu0 %465 }
  0xe2   : > { %1663 = vrsqrt.f32 %v328_v45 }
  0xe3   : > { %1665 = vrsqrt.f32 %v329_v12  ;;  %v459_v39 = vmul.f32 %v2065_v38, %v2065_v38  ;;  %v460_v40 = vmul.f32 %v2069_v5, %v2069_v5 }
  0xe4   : > { %371 = vxpose.xlu0.b32.cont [7/16] %v355_v44, 128  ;;  %1667 = vrsqrt.f32 %v330_v55 }
  0xe5   : > { %1669 = vrsqrt.f32 %v331_v59  ;;  %v495_v59 = vmax.f32 %v466_v43, 1e-24 }
  0xe6   : > { %1671 = vrsqrt.f32 %v332_v62 }
  0xe8   : > { %372 = vxpose.xlu0.b32.cont [8/16] %v356_v48, 128 }
  0xe9   : > { %v1658_v52 = vpop.eup %1657 }
  0xea   : > { %v1660_v53 = vpop.eup %1659  ;;  %v526_v54 = vmul.f32 10.0, %v1658_v52 }
  0xeb   : > { %v525_v16 = vmul.f32 10.0, %v1660_v53  ;;  %v1662_v58 = vpop.eup %1661 }
  0xec   : > { %373 = vxpose.xlu0.b32.cont [9/16] %v357_v51, 128  ;;  %v542_v57 = vmul.f32 %v1984_v41, %v526_v54  ;;  %v359_v21 = vmul.f32 %v1662_v58, %v1959_v26  ;;  %v1664_v61 = vpop.eup %1663 }
  0xed   : > { %v541_v17 = vmul.f32 %v1986_v42, %v525_v16  ;;  %v360_v63 = vmul.f32 %v1664_v61, %v1961_v27  ;;  %v1666_v22 = vpop.eup %1665  ;;  %v1506_v27 = vld [vmem:[%s1910_s21 + $0x20] sm:$0xff]  }
  0xee   : > { %v361_v41 = vmul.f32 %v1666_v22, %v1967_v31  ;;  %v1668_v42 = vpop.eup %1667  ;;  %v2020_v8 = vunpack.c.l.bf16 %v1506_v27  ;;  %v2022_v9 = vunpack.c.h.bf16 %v1506_v27  ;;  %v1507_v31 = vld [vmem:[%s1910_s21 + $0x28] sm:$0xff]   ;;  %s2163_s21 = sand.u32 1, %s1793_s16  }
  0xef   : > { %v557_v60 = vpack.c.bf16 %v542_v57, %v541_v17  ;;  %v362_v0 = vmul.f32 %v1668_v42, %v1969_v32  ;;  %v1670_v1 = vpop.eup %1669  ;;  %v2029_v10 = vunpack.c.l.bf16 %v1507_v31  ;;  %v2033_v13 = vunpack.c.h.bf16 %v1507_v31  ;;  %s1325_s18 = scalar_lea.sflag [#allocation6], %s2163_s21 }
  0xf0   : > { %374 = vxpose.xlu0.b32.cont [10/16] %v358_v56, 128  ;;  %v363_v26 = vmul.f32 %v1670_v1, %v1975_v36  ;;  %v1672_v6 = vpop.eup %1671  ;;  %v453_v32 = vmul.f32 %v2020_v8, %v2020_v8  ;;  %v454_v36 = vmul.f32 %v2022_v9, %v2022_v9  ;;  %v468_v56 = vpop.xlane.xlu1 %467 }
  0xf1   : > { %1542 = vmatprep.mubr.bf16.mxu0 %v557_v60  ;;  %v364_v7 = vmul.f32 %v1672_v6, %v1977_v37  ;;  %v455_v37 = vmul.f32 %v2029_v10, %v2029_v10  ;;  %v456_v15 = vmul.f32 %v2033_v13, %v2033_v13  ;;  %v496_v17 = vmax.f32 %v468_v56, 1e-24 }
  0xf2   : > { %477 = vadd.xlane.f32.xlu1 %v453_v32 }
  0xf3   : > { %1673 = vrsqrt.f32 %v496_v17 }
  0xf4   : > { %375 = vxpose.xlu0.b32.cont [11/16] %v359_v21, 128  ;;  %1675 = vrsqrt.f32 %v495_v59 }
  0xf6   : > { %479 = vadd.xlane.f32.xlu1 %v454_v36  ;;  %v1812_v36 = vmov 0  }
  0xf7   : > { %1635 = vset.pattern.permute.xlu1 %v1812_v36 }
  0xf8   : > { %376 = vxpose.xlu0.b32.cont [12/16] %v360_v63, 128 }
  0xfa   : > { %481 = vadd.xlane.f32.xlu1 %v455_v37 }
  0xfc   : > { %377 = vxpose.xlu0.b32.cont [13/16] %v361_v41, 128 }
  0xfd   : > { %v1674_v22 = vpop.eup %1673 }
  0xfe   : > { %483 = vadd.xlane.f32.xlu1 %v456_v15  ;;  %v1676_v42 = vpop.eup %1675  ;;  %v528_v1 = vmul.f32 10.0, %v1674_v22 }
 0x100   : > { %378 = vxpose.xlu0.b32.cont [14/16] %v362_v0, 128 }
 0x102   : > { %469 = vadd.xlane.f32.xlu1 %v449_v19 }
 0x104   : > { %379 = vxpose.xlu0.b32.cont [15/16] %v363_v26, 128  ;;  %v527_v26 = vmul.f32 10.0, %v1676_v42 }
 0x106   : > { %471 = vadd.xlane.f32.xlu1 %v450_v23  ;;  %v543_v27 = vmul.f32 %v1995_v47, %v527_v26 }
 0x108   : > { %380 = vxpose.xlu0.b32.end [16/16] %v364_v7, 128  ;;  %v544_v7 = vmul.f32 %v1993_v46, %v528_v1 }
 0x10a   : > { %485 = vadd.xlane.f32.xlu1 %v457_v25  ;;  %v558_v32 = vpack.c.bf16 %v544_v7, %v543_v27 }
 0x10e   : > { %487 = vadd.xlane.f32.xlu1 %v458_v29 }
 0x112   : > { %473 = vadd.xlane.f32.xlu1 %v451_v33 }
 0x116   : > { %475 = vadd.xlane.f32.xlu1 %v452_v35 }
 0x11a   : > { %489 = vadd.xlane.f32.xlu1 %v459_v39 }
 0x11e   : > { %491 = vadd.xlane.f32.xlu1 %v460_v40 }
 0x131   : > { %1636 = vset.pattern.permute.xlu0 %v1812_v36 }
 0x14c   : > { %v381_v44 = vpop.trf.xlu0 }
 0x150   : > { %v382_v11 = vpop.trf.xlu0 }
 0x151   : > { %v397_v45 = vpack.c.bf16 %v382_v11, %v381_v44 }
 0x153   : > { %1526 = vmatprep.subr.bf16.mxu0 %v397_v45  ;;  %1558 = vmatprep.subr.bf16.mxu1 %v397_v45 }
 0x154   : > { %1527 = vmatpush3.bf16.msra.mxu0 %v397_v45  ;;  %1566 = vmatpush3.bf16.msra.mxu1 %v397_v45  ;;  %v383_v48 = vpop.trf.xlu0 }
 0x158   : > { %v384_v49 = vpop.trf.xlu0 }
 0x159   : > { %v398_v12 = vpack.c.bf16 %v384_v49, %v383_v48 }
 0x15b   : > { %1528 = vmatprep.subr.bf16.mxu0 %v398_v12  ;;  %1559 = vmatprep.subr.bf16.mxu1 %v398_v12 }
 0x15c   : > { %1529 = vmatpush3.bf16.msra.mxu0 %v398_v12  ;;  %1567 = vmatpush3.bf16.msra.mxu1 %v398_v12  ;;  %v385_v50 = vpop.trf.xlu0 }
 0x160   : > { %v386_v51 = vpop.trf.xlu0 }
 0x161   : > { %v399_v52 = vpack.c.bf16 %v386_v51, %v385_v50 }
 0x163   : > { %1530 = vmatprep.subr.bf16.mxu0 %v399_v52  ;;  %1560 = vmatprep.subr.bf16.mxu1 %v399_v52 }
 0x164   : > { %1531 = vmatpush3.bf16.msra.mxu0 %v399_v52  ;;  %1568 = vmatpush3.bf16.msra.mxu1 %v399_v52  ;;  %v387_v53 = vpop.trf.xlu0 }
 0x168   : > { %v388_v54 = vpop.trf.xlu0 }
 0x169   : > { %v400_v55 = vpack.c.bf16 %v388_v54, %v387_v53 }
 0x16b   : > { %1532 = vmatprep.subr.bf16.mxu0 %v400_v55  ;;  %1561 = vmatprep.subr.bf16.mxu1 %v400_v55 }
 0x16c   : > { %1533 = vmatpush3.bf16.msra.mxu0 %v400_v55  ;;  %1569 = vmatpush3.bf16.msra.mxu1 %v400_v55  ;;  %v389_v16 = vpop.trf.xlu0 }
 0x170   : > { %v390_v57 = vpop.trf.xlu0 }
 0x171   : > { %v401_v58 = vpack.c.bf16 %v390_v57, %v389_v16 }
 0x173   : > { %1534 = vmatprep.subr.bf16.mxu0 %v401_v58  ;;  %1562 = vmatprep.subr.bf16.mxu1 %v401_v58 }
 0x174   : > { %1535 = vmatpush3.bf16.msra.mxu0 %v401_v58  ;;  %1570 = vmatpush3.bf16.msra.mxu1 %v401_v58  ;;  %v391_v60 = vpop.trf.xlu0 }
 0x178   : > { %v392_v21 = vpop.trf.xlu0 }
 0x179   : > { %v402_v61 = vpack.c.bf16 %v392_v21, %v391_v60 }
 0x17b   : > { %1536 = vmatprep.subr.bf16.mxu0 %v402_v61  ;;  %1563 = vmatprep.subr.bf16.mxu1 %v402_v61 }
 0x17c   : > { %1537 = vmatpush3.bf16.msra.mxu0 %v402_v61  ;;  %1571 = vmatpush3.bf16.msra.mxu1 %v402_v61  ;;  %v393_v62 = vpop.trf.xlu0 }
 0x17f   : > { %v478_v37 = vpop.xlane.xlu1 %477 }
 0x180   : > { %v394_v63 = vpop.trf.xlu0  ;;  %v501_v14 = vmax.f32 %v478_v37, 1e-24 }
 0x181   : > { %v403_v41 = vpack.c.bf16 %v394_v63, %v393_v62 }
 0x182   : > { %1677 = vrsqrt.f32 %v501_v14 }
 0x183   : > { %1538 = vmatprep.subr.bf16.mxu0 %v403_v41  ;;  %1564 = vmatprep.subr.bf16.mxu1 %v403_v41  ;;  %v480_v15 = vpop.xlane.xlu1 %479 }
 0x184   : > { %1539 = vmatpush3.bf16.msra.mxu0 %v403_v41  ;;  %1572 = vmatpush3.bf16.msra.mxu1 %v403_v41  ;;  %v395_v0 = vpop.trf.xlu0  ;;  %v502_v19 = vmax.f32 %v480_v15, 1e-24 }
 0x186   : > { %1679 = vrsqrt.f32 %v502_v19 }
 0x187   : > { %v482_v2 = vpop.xlane.xlu1 %481 }
 0x188   : > { %v396_v6 = vpop.trf.xlu0  ;;  %v503_v46 = vmax.f32 %v482_v2, 1e-24 }
 0x189   : > { %v404_v31 = vpack.c.bf16 %v396_v6, %v395_v0 }
 0x18a   : > { %1681 = vrsqrt.f32 %v503_v46 }
 0x18b   : > { %1540 = vmatprep.subr.bf16.mxu0 %v404_v31  ;;  %1565 = vmatprep.subr.bf16.mxu1 %v404_v31  ;;  %v484_v47 = vpop.xlane.xlu1 %483 }
 0x18c   : > { %1541 = vmatpush3.bf16.msra.mxu0 %v404_v31  ;;  %1573 = vmatpush3.bf16.msra.mxu1 %v404_v31  ;;  %v1678_v23 = vpop.eup %1677  ;;  %v504_v25 = vmax.f32 %v484_v47, 1e-24 }
 0x18d   : > { %v533_v3 = vmul.f32 10.0, %v1678_v23  ;;  %v670_v23 = vld [vmem:[%s2151_s0] sm:$0xff] }
 0x18e   : > { %1683 = vrsqrt.f32 %v504_v25 }
 0x18f   : > { %1543 = vmatmul.mubr.bf16.vlgmr.msra.gmra.mrb[0].mxu0 %v558_v32  ;;  %v470_v29 = vpop.xlane.xlu1 %469  ;;  %v549_v39 = vmul.f32 %v2020_v8, %v533_v3 }
 0x190   : > { %v1680_v33 = vpop.eup %1679  ;;  %v497_v34 = vmax.f32 %v470_v29, 1e-24 }
 0x191   : > { %v534_v35 = vmul.f32 10.0, %v1680_v33 }
 0x192   : > { %1685 = vrsqrt.f32 %v497_v34 }
 0x193   : > { %v472_v40 = vpop.xlane.xlu1 %471  ;;  %v550_v43 = vmul.f32 %v2022_v9, %v534_v35 }
 0x194   : > { %v1682_v44 = vpop.eup %1681  ;;  %v498_v11 = vmax.f32 %v472_v40, 1e-24 }
 0x195   : > { %v535_v45 = vmul.f32 10.0, %v1682_v44  ;;  %v561_v48 = vpack.c.bf16 %v550_v43, %v549_v39  ;;  %v810_v43 = vstv %s809_s29 }
 0x196   : > { %1687 = vrsqrt.f32 %v498_v11  ;;  %vm811_vm1 = vcmp.eq.s32.totalorder %v810_v43, 1 }
 0x197   : > { %v486_v49 = vpop.xlane.xlu1 %485  ;;  %1550 = vmatprep.mubr.bf16.mxu1 %v561_v48  ;;  %v551_v51 = vmul.f32 %v2029_v10, %v535_v45  ;;  %v1814_v48 = vmov 0.0  }
 0x198   : > { %v1684_v12 = vpop.eup %1683  ;;  %v505_v50 = vmax.f32 %v486_v49, 1e-24 }
 0x199   : > { %v536_v52 = vmul.f32 10.0, %v1684_v12 }
 0x19a   : > { %1689 = vrsqrt.f32 %v505_v50 }
 0x19b   : > { %v552_v53 = vmul.f32 %v2033_v13, %v536_v52  ;;  %v488_v8 = vpop.xlane.xlu1 %487 }
 0x19c   : > { %v1686_v54 = vpop.eup %1685  ;;  %v506_v55 = vmax.f32 %v488_v8, 1e-24 }
 0x19d   : > { %v529_v16 = vmul.f32 10.0, %v1686_v54  ;;  %v562_v9 = vpack.c.bf16 %v552_v53, %v551_v51 }
 0x19e   : > { %1691 = vrsqrt.f32 %v506_v55 }
 0x19f   : > { %1551 = vmatmul.mubr.bf16.vlgmr.msra.gmra.mrb[0].mxu1 %v562_v9  ;;  %v545_v57 = vmul.f32 %v2038_v18, %v529_v16  ;;  %v474_v22 = vpop.xlane.xlu1 %473 }
 0x1a0   : > { %v1688_v56 = vpop.eup %1687  ;;  %v499_v42 = vmax.f32 %v474_v22, 1e-24 }
 0x1a1   : > { %v530_v58 = vmul.f32 10.0, %v1688_v56 }
 0x1a2   : > { %1693 = vrsqrt.f32 %v499_v42 }
 0x1a3   : > { %v546_v17 = vmul.f32 %v2042_v20, %v530_v58  ;;  %v476_v41 = vpop.xlane.xlu1 %475 }
 0x1a4   : > { %v1690_v59 = vpop.eup %1689  ;;  %v500_v18 = vmax.f32 %v476_v41, 1e-24 }
 0x1a5   : > { %v537_v60 = vmul.f32 10.0, %v1690_v59  ;;  %v559_v10 = vpack.c.bf16 %v546_v17, %v545_v57 }
 0x1a6   : > { %1695 = vrsqrt.f32 %v500_v18 }
 0x1a7   : > { %1546 = vmatprep.mubr.bf16.mxu0 %v559_v10  ;;  %v553_v13 = vmul.f32 %v2047_v24, %v537_v60  ;;  %v490_v0 = vpop.xlane.xlu1 %489 }
 0x1a8   : > { %v1692_v21 = vpop.eup %1691  ;;  %v507_v1 = vmax.f32 %v490_v0, 1e-24 }
 0x1a9   : > { %v538_v61 = vmul.f32 10.0, %v1692_v21 }
 0x1aa   : > { %1697 = vrsqrt.f32 %v507_v1 }
 0x1ab   : > { %v554_v62 = vmul.f32 %v2051_v28, %v538_v61  ;;  %v492_v20 = vpop.xlane.xlu1 %491 }
 0x1ac   : > { %v508_v26 = vmax.f32 %v492_v20, 1e-24  ;;  %v1694_v24 = vpop.eup %1693 }
 0x1ad   : > { %v563_v63 = vpack.c.bf16 %v554_v62, %v553_v13  ;;  %v531_v32 = vmul.f32 10.0, %v1694_v24 }
 0x1ae   : > { %1699 = vrsqrt.f32 %v508_v26 }
 0x1af   : > { %1554 = vmatprep.mubr.bf16.mxu1 %v563_v63  ;;  %v547_v14 = vmul.f32 %v2056_v30, %v531_v32  ;;  %v755_v30 = vlaneseq }
 0x1b0   : > { %v1696_v28 = vpop.eup %1695 }
 0x1b1   : > { %v532_v36 = vmul.f32 10.0, %v1696_v28  ;;  %v756_v35 = vshrl.u32 %v755_v30, 7  ;;  %v791_v39 = vand.u32 127, %v755_v30 }
 0x1b3   : > { %v548_v15 = vmul.f32 %v2060_v4, %v532_v36  ;;  %vm792_vm0 = vcmp.eq.s32.totalorder %v756_v35, %v791_v39  ;;  %vm828_vm3 = vcmp.lt.s32.totalorder %v791_v39, 8  ;;  %vm1318_vm10 = vcmp.eq.s32.totalorder %v756_v35, 0 }
 0x1b4   : > { %v1698_v37 = vpop.eup %1697  ;;  %vm812_vm2 = vmand %vm792_vm0, %vm811_vm1  ;;  %vm1319_vm11 = vcmp.eq.s32.totalorder %v791_v39, 0 }
 0x1b5   : > { %v539_v2 = vmul.f32 10.0, %v1698_v37  ;;  %v560_v47 = vpack.c.bf16 %v548_v15, %v547_v14  ;;  %vm845_vm5 = vmxor %vm812_vm2, %vm1813_vm4 }
 0x1b6   : > { %vm1320_vm12 = vmand %vm1318_vm10, %vm1319_vm11 }
 0x1b7   : > { %1547 = vmatmul.mubr.bf16.gmra.mrb[4].mxu0 %v560_v47  ;;  %v555_v25 = vmul.f32 %v2065_v38, %v539_v2  ;;  %v1447_v38 = vld [vmem:[%s2152_s1] ss:$0 sm:$0xff] }
 0x1b8   : > { %v1700_v19 = vpop.eup %1699 }
 0x1b9   : > { %v540_v46 = vmul.f32 10.0, %v1700_v19 }
 0x1bb   : > { %v556_v3 = vmul.f32 %v2069_v5, %v540_v46 }
 0x1bd   : > { %v564_v29 = vpack.c.bf16 %v556_v3, %v555_v25 }
 0x1bf   : > { %1555 = vmatmul.mubr.bf16.gmra.mrb[4].mxu1 %v564_v29 }
 0x262   : > { %v1544_v6 = vpop.f32.mrb[0].mxu0 }
 0x263   : > { %v607_v7 = vpop.f32.mrb[1].mxu0 }
 0x264   : > { %877 = vmax.xlane.f32.xlu1 %v607_v7  ;;  %v1545_v27 = vpop.f32.mrb[2].mxu0 }
 0x265   : > { %v610_v31 = vpop.f32.mrb[3].mxu0 }
 0x272   : > { %v1552_v4 = vpop.f32.mrb[0].mxu1 }
 0x273   : > { %v639_v33 = vpop.f32.mrb[1].mxu1 }
 0x274   : > { %v1553_v34 = vpop.f32.mrb[2].mxu1 }
 0x275   : > { %688 = vperm.xlu1 %1635, %v670_v23   ;;  %v642_v40 = vpop.f32.mrb[3].mxu1 }
 0x28a   : > { %v1548_v52 = vpop.f32.mrb[4].mxu0 }
 0x28b   : > { %v623_v53 = vpop.f32.mrb[5].mxu0 }
 0x28c   : > { %v1549_v8 = vpop.f32.mrb[6].mxu0 }
 0x28d   : > { %v626_v54 = vpop.f32.mrb[7].mxu0 }
 0x292   : > { %v1556_v55 = vpop.f32.mrb[4].mxu1 }
 0x293   : > { %v655_v16 = vpop.f32.mrb[5].mxu1 }
 0x294   : > { %v1557_v9 = vpop.f32.mrb[6].mxu1 }
 0x295   : > { %v658_v56 = vpop.f32.mrb[7].mxu1 }
 0x2f1   : > { %v878_v44 = vpop.xlane.xlu1 %877 }
 0x2f2   : > { %v909_v11 = vsub.f32 %v607_v7, %v878_v44 }
 0x2f4   : > { %v925_v5 = vmul.f32 1.442695, %v909_v11 }
 0x2f5   : > { %v689_v45 = vpop.permute.xlu1 %688 }
 0x2f6   : > { %1701 = vpow2.f32 %v925_v5  ;;  %vm739_vm6 = vcmp.eq.s32.totalorder %v689_v45, %v1447_v38 }
 0x2f7   : > { %vm829_vm7 = vmand %vm739_vm6, %vm828_vm3 }
 0x2f8   : > { %vm861_vm8 = vmand %vm829_vm7, %vm845_vm5 }
 0x2f9   : > { %v1448_v49 = vsel %vm861_vm8, 1.0, %v1814_v48  ;;  %v1085_v51 = vsel %vm861_vm8, %v909_v11, 0.0 }
 0x2fa   : > { %1053 = vadd.xlane.f32.xlu0 %v1448_v49 }
 0x300   : > { %v1702_v12 = vpop.eup %1701 }
 0x301   : > { %v957_v50 = vsel %vm861_vm8, %v1702_v12, 0.0 }
 0x302   : > { %973 = vadd.xlane.f32.xlu1 %v957_v50 }
 0x306   : > { %1101 = vadd.xlane.f32.xlu1 %v1085_v51 }
 0x387   : > { %v1054_v17 = vpop.xlane.xlu0 %1053 }
 0x388   : > { %v1197_v60 = vsub.f32 8.0, %v1054_v17 }
 0x38a   : > { %v1213_v61 = vmul.f32 23.02585, %v1197_v60 }
 0x38f   : > { %v974_v57 = vpop.xlane.xlu1 %973 }
 0x390   : > { %v1005_v58 = vadd.f32 1e-10, %v974_v57 }
 0x392   : > { %1703 = vlog2.f32 %v1005_v58 }
 0x393   : > { %v1102_v13 = vpop.xlane.xlu1 %1101 }
 0x39c   : > { %v1704_v59 = vpop.eup %1703 }
 0x39d   : > { %v1134_v10 = vmul.f32 0.6931472, %v1704_v59 }
 0x39f   : > { %v1165_v21 = vmul.f32 %v1134_v10, %v1054_v17 }
 0x3a1   : > { %v1181_v62 = vsub.f32 %v1165_v21, %v1102_v13 }
 0x3a3   : > { %v1229_v63 = vadd.f32 %v1213_v61, %v1181_v62 }
 0x3a5   : > { %v1278_v22 = vsel %vm1277_vm9, %v1229_v63, 0.0 }
 0x3a6   : > { %1309 = vadd.xlane.f32.xlu1 %v1278_v22 }
 0x433   : > { %v1310_v41 = vpop.xlane.xlu1 %1309 }
 0x434   : > { %v1311_v42 = vrot.slane %v1310_v41, 4 }
 0x436   : > { %v1312_v0 = vadd.f32 %v1311_v42, %v1310_v41 }
 0x438   : > { %v1313_v18 = vrot.slane %v1312_v0, 2 }
 0x43a   : > { %v1314_v20 = vadd.f32 %v1313_v18, %v1312_v0 }
 0x43c   : > { %v1315_v1 = vrot.slane %v1314_v20, 1 }
 0x43e   : > { %v1316_v26 = vadd.f32 %v1315_v1, %v1314_v20 }
 0x440   : > { %1574 = vpush %v1316_v26 }
 0x471   : > { %s1575_s11 = spop %1574 }
 0x472   : > { %v1321_v6 = vstv %s1575_s11 }
 0x473   : > { %v1322_v7 = vsel %vm1320_vm12, %v1321_v6, 0.0 }
 0x474   : > { %1323 = vst [vmem:[%s205_s6] sm:$0xff] %v1322_v7 }
 0x475   : > { %1742 = shalt.err (!%p1739_p6)
}
 0x476   : > { %s1743_s30 = scalar_lea.hbm %s2100_s14, 128  ;;  %s1747_s23 = scalar_lea.hbm %s2155_s4, 256 }
 0x477   : > { %p1744_p7 = scmp.ne.s32.totalorder %s2100_s14, %s1743_s30  ;;  %p1748_p11 = scmp.lt.u32.totalorder %s2100_s14, %s2155_s4 }
 0x478   : > { %p1749_p12 = scmp.lt.u32.totalorder %s1747_s23, %s1743_s30  ;;  %p1751_p0 = scmp.lt.u32.totalorder %s1743_s30, %s2100_s14 }
 0x479   : > { %p1745_p9 = pnand %p1744_p7, %p1881_p4 }
 0x47a   : > { %p1750_p13 = por %p1749_p12, %p1748_p11 }
 0x47b   : > { %p1746_p10 = pneg %p1745_p9 }
 0x47c   : > { %p1752_p1 = por %p1751_p0, %p1750_p13 }
 0x47e   : > { %p1753_p2 = pnand %p1752_p1, %p1746_p10 }
 0x480   : > { %1756 = shalt.err (!%p1753_p2)
}
 0x481   : > { %1576 = dma.vmem_to_hbm [thread:$0]  (%p1881_p4), %s2102_s10, 128, %s2100_s14, %s1325_s18  }
 0x482 PF: > { %p1582_p3 = scmp.ge.s32.totalorder %s1809_s20, 2  ;;  %s1351_s8 = sand.u32 1, %s1789_s15  }
 0x483   : > { %s1352_s9 = scalar_lea.sflag [#allocation6], %s1351_s8 }
 0x484   : > { %p1579_p5 = pnand %p1582_p3, %p1888_p8 }
 0x486   : > { %1784 = dma.done.wait (!%p1579_p5), %s1352_s9, 128  }
 0x487   : > { %1786 = vsyncadd (!%p1579_p5), %s1352_s9, 4294967168  ;;  %s17_s20 = sadd.s32 1, %s1809_s20   ;;  %s2164_s18 = sld [smem:[#allocation13_spill]] }
 0x488   : > { %p14_p6 = scmp.ge.s32.totalorder %s17_s20, 4   ;;  %s2165_s19 = sld [smem:[#allocation14_spill]] }
 0x489   : > { %s2166_s15 = smov %s1793_s16  ;;  %s2167_s16 = smov %s1797_s17 }
 0x48a   : > { %s2168_s17 = smov %s1894_s28  ;;  %16 = sbr.rel (!%p14_p6) target bundleno = 4 (0x4), region = 79 }
 0x491   :  { %1357 = vsyncpa [#allocation6], 1 }
 0x492   :  { %1359 = vsyncpa [#allocation6 + $0x1], 1 }
 0x493   :  { %1360 = vsyncmov [#allocation4] }
 0x496   :  { %s1361_s25 = vpop.sfrf %1360 }
 0x497   :  { %p1468_p4 = scmp.ne.s32.totalorder %s1361_s25, 0 }
 0x499   :  { %1365 = shalt.err (%p1468_p4)  }

</bundles_post_ra>
